<compile_context>
chip_gen: v7x
topology: tpu7x:2x2x1
jax: 0.10.0
libtpu: 0.0.40
codegen_flags: <defaults>
</compile_context>

<pallas_src>
import jax
import jax.numpy as jnp
from jax.experimental import pallas as pl
from jax.experimental.pallas import tpu as pltpu

# ----------------------------- hyper-params (small) -----------------------------
N_NODES = 16          # nodes per graph
INPUT_DIM = 8         # data.x feature dim
HIDDEN = 16           # hidden_dim (kept small; module default is 64)
HEADS = 2
NUM_OUTPUTS = 6
NUM_LAYERS = 3        # conv1 + 1 middle conv + convout
NEG_SLOPE = 0.2       # PyG GATConv leaky_relu negative_slope
BATCH = 4             # graphs per pallas_call (grid axis, "parallel")

# ------------------------- packed buffer layouts (static) ------------------------
W1_COLS = HEADS * HIDDEN + 2 * HEADS      # 36 : [W | W@a_src | W@a_dst]
W2_COLS = W1_COLS                         # 36
W3_COLS = NUM_OUTPUTS + 2                 # 8
SLAB_W = W1_COLS                          # widest row of the weight slab
# row offsets, aligned to bf16 sublane packing (pairs / 16-row vreg tiles)
W1_R, B1_R = 0, 8
W2_R, B2_R = 16, 48
W3_R, B3_R = 64, 96
SLAB_ROWS = 112
DATA_W = INPUT_DIM + N_NODES              # 24 : [x | mask_bias]


# --------------------------------- fused kernel ----------------------------------
def _gat_heads(x_f32, mask_bias, w_ext_bf16, heads, f_out):
    """One GATConv's per-head aggregation. Returns list of [N, f_out] f32 arrays.

    w_ext = [W | W@a_src (per head) | W@a_dst (per head)]  (bf16), so a single MXU
    matmul yields both transformed features and per-node attention scores.
    """
    xp = jnp.dot(x_f32.astype(jnp.bfloat16), w_ext_bf16,
                 preferred_element_type=jnp.float32)       # [N, heads*f_out + 2*heads]
    outs = []
    for h in range(heads):                                  # small static loop
        xh = xp[:, h * f_out:(h + 1) * f_out]               # [N, f_out]
        s_src = xp[:, heads * f_out + h: heads * f_out + h + 1]                  # [N,1]
        s_dst = xp[:, heads * f_out + heads + h: heads * f_out + heads + h + 1]  # [N,1]
        # e[i, j] = leaky_relu(s_dst[i] + s_src[j]); additive mask for non-edges.
        logits = s_dst + jnp.transpose(s_src)                # [N, N]
        logits = jnp.maximum(logits, NEG_SLOPE * logits)     # leaky_relu (slope < 1)
        logits = logits + mask_bias
        # softmax over source nodes j (per target i); self-loops guarantee a valid row
        m = jnp.max(logits, axis=-1, keepdims=True)
        p = jnp.exp(logits - m)
        alpha = p * pl.reciprocal(jnp.sum(p, axis=-1, keepdims=True), approx=True)
        # out_i = sum_j alpha[i, j] * xh[j]   (f32 matmul: latency-bound, free parity)
        outs.append(jnp.dot(alpha, xh, preferred_element_type=jnp.float32))
    return outs


def fused_gatnet_kernel(data_ref, wslab_ref, out_ref):
    # per-graph packed data: [x | mask_bias]
    x = data_ref[:, 0:INPUT_DIM]                            # [N, 8]   f32
    mask_bias = data_ref[:, INPUT_DIM:DATA_W]               # [N, N]   f32 (0 / -1e30)

    # static slices of the packed bf16 parameter slab (zero-cost ref views)
    w1 = wslab_ref[W1_R:W1_R + INPUT_DIM, 0:W1_COLS]
    b1 = wslab_ref[B1_R:B1_R + 1, 0:HEADS * HIDDEN]
    w2 = wslab_ref[W2_R:W2_R + HEADS * HIDDEN, 0:W2_COLS]
    b2 = wslab_ref[B2_R:B2_R + 1, 0:HEADS * HIDDEN]
    w3 = wslab_ref[W3_R:W3_R + HEADS * HIDDEN, 0:W3_COLS]
    b3 = wslab_ref[B3_R:B3_R + 1, 0:NUM_OUTPUTS]

    # ---- conv1: INPUT_DIM -> HEADS*HIDDEN, ReLU (activation stays in vregs) ----
    h = jnp.concatenate(_gat_heads(x, mask_bias, w1, HEADS, HIDDEN), axis=-1)
    h = jnp.maximum(h + b1, 0.0)

    # ---- middle conv: HEADS*HIDDEN -> HEADS*HIDDEN, ReLU ----
    h = jnp.concatenate(_gat_heads(h, mask_bias, w2, HEADS, HIDDEN), axis=-1)
    h = jnp.maximum(h + b2, 0.0)

    # ---- convout: HEADS*HIDDEN -> NUM_OUTPUTS (1 head, no ReLU) + log_softmax ----
    (z,) = _gat_heads(h, mask_bias, w3, 1, NUM_OUTPUTS)
    z = z + b3
    m = jnp.max(z, axis=-1, keepdims=True)
    s = z - m
    out_ref[...] = s - jnp.log(jnp.sum(jnp.exp(s), axis=-1, keepdims=True))


def gatnet_forward(wslab, data):
    """data: [B, N, INPUT_DIM + N] packed [x | mask_bias]; wslab: packed bf16 params."""
    B = data.shape[0]
    return pl.pallas_call(
        fused_gatnet_kernel,
        out_shape=jax.ShapeDtypeStruct((B, N_NODES, NUM_OUTPUTS), jnp.float32),
        grid_spec=pltpu.PrefetchScalarGridSpec(
            num_scalar_prefetch=0,
            grid=(B,),
            in_specs=[
                pl.BlockSpec((None, N_NODES, DATA_W), lambda b: (b, 0, 0)),
                pl.BlockSpec((SLAB_ROWS, SLAB_W), lambda b: (0, 0)),   # VMEM-resident
            ],
            out_specs=pl.BlockSpec((None, N_NODES, NUM_OUTPUTS), lambda b: (b, 0, 0)),
        ),
        compiler_params=pltpu.CompilerParams(
            dimension_semantics=("parallel",)),     # batch axis shards across cores
    )(data, wslab)


# --------------------------------- parameter setup --------------------------------
def glorot(key, shape):
    fan_in, fan_out = shape[-2], shape[-1]
    limit = jnp.sqrt(6.0 / (fan_in + fan_out))
    return jax.random.uniform(key, shape, jnp.float32, -limit, limit)


def init_gatconv_params(key, in_dim, out_dim, heads):
    """Glorot init; fold a_src/a_dst into the weight as extra score columns; bf16."""
    kw, ks, kd = jax.random.split(key, 3)
    w = glorot(kw, (in_dim, heads * out_dim))
    a_src = glorot(ks, (heads, out_dim))
    a_dst = glorot(kd, (heads, out_dim))
    bias = jnp.zeros((1, heads * out_dim), jnp.float32)
    w_heads = w.reshape(in_dim, heads, out_dim)
    ws = jnp.einsum('fhk,hk->fh', w_heads, a_src)           # [F_in, heads]
    wd = jnp.einsum('fhk,hk->fh', w_heads, a_dst)           # [F_in, heads]
    w_ext = jnp.concatenate([w, ws, wd], axis=1)            # [F_in, heads*out + 2*heads]
    # persistent bf16 parameters (f32 accumulation on the MXU)
    return (w_ext.astype(jnp.bfloat16), bias.astype(jnp.bfloat16))


def init_gatnet_params(key):
    keys = jax.random.split(key, NUM_LAYERS)
    conv1 = init_gatconv_params(keys[0], INPUT_DIM, HIDDEN, HEADS)
    convs = [init_gatconv_params(keys[i], HEADS * HIDDEN, HIDDEN, HEADS)
             for i in range(1, NUM_LAYERS - 1)]
    convout = init_gatconv_params(keys[-1], HEADS * HIDDEN, NUM_OUTPUTS, 1)
    return {"conv1": conv1, "convs": convs, "convout": convout}


def pack_param_slab(params):
    """All folded weights + biases -> one padded bf16 slab (single DMA). Setup-time."""
    w1, b1 = params["conv1"]
    w2, b2 = params["convs"][0]           # num_layers=3 -> exactly one middle conv
    w3, b3 = params["convout"]
    slab = jnp.zeros((SLAB_ROWS, SLAB_W), jnp.bfloat16)
    slab = slab.at[W1_R:W1_R + INPUT_DIM, 0:W1_COLS].set(w1)
    slab = slab.at[B1_R:B1_R + 1, 0:HEADS * HIDDEN].set(b1)
    slab = slab.at[W2_R:W2_R + HEADS * HIDDEN, 0:W2_COLS].set(w2)
    slab = slab.at[B2_R:B2_R + 1, 0:HEADS * HIDDEN].set(b2)
    slab = slab.at[W3_R:W3_R + HEADS * HIDDEN, 0:W3_COLS].set(w3)
    slab = slab.at[B3_R:B3_R + 1, 0:NUM_OUTPUTS].set(b3)
    return slab


def edges_to_mask_bias(edge_index, n):
    # adj[dst, src] = 1 ; PyG GATConv adds self-loops -> set the diagonal too.
    src, dst = edge_index[0], edge_index[1]
    adj = jnp.zeros((n, n), jnp.float32).at[dst, src].set(1.0)
    adj = jnp.maximum(adj, jnp.eye(n, dtype=jnp.float32))
    # additive mask: 0 on edges, -1e30 elsewhere (safe: every row has a self-loop)
    return jnp.where(adj > 0, 0.0, -1e30).astype(jnp.float32)


def pack_graph(x, mask_bias):
    """[x | mask_bias] along lanes -> one f32 buffer per graph."""
    return jnp.concatenate([x, mask_bias], axis=-1)


# ------------------------------ pure-JAX reference ---------------------------------
def gatnet_reference(params, x, mask_bias):
    """Same numerics path as the kernel (bf16 MXU operands, f32 accum, exact recip)."""
    def layer(h, w_ext, b, heads, f_out):
        xp = jnp.dot(h.astype(jnp.bfloat16), w_ext, preferred_element_type=jnp.float32)
        outs = []
        for hh in range(heads):
            xh = xp[:, hh * f_out:(hh + 1) * f_out]
            s_src = xp[:, heads * f_out + hh: heads * f_out + hh + 1]
            s_dst = xp[:, heads * f_out + heads + hh: heads * f_out + heads + hh + 1]
            logits = s_dst + s_src.T
            logits = jnp.maximum(logits, NEG_SLOPE * logits) + mask_bias
            alpha = jax.nn.softmax(logits, axis=-1)
            outs.append(jnp.dot(alpha, xh, preferred_element_type=jnp.float32))
        return jnp.concatenate(outs, axis=-1) + b.astype(jnp.float32)

    w1, b1 = params["conv1"]
    w2, b2 = params["convs"][0]
    w3, b3 = params["convout"]
    h = jnp.maximum(layer(x, w1, b1, HEADS, HIDDEN), 0.0)
    h = jnp.maximum(layer(h, w2, b2, HEADS, HIDDEN), 0.0)
    z = layer(h, w3, b3, 1, NUM_OUTPUTS)
    return jax.nn.log_softmax(z, axis=-1)


# ------------------------------------- main ---------------------------------------
if __name__ == "__main__":
    key = jax.random.PRNGKey(0)
    k_feat, k_param = jax.random.split(key)

    # deterministic node features for a small batch of graphs
    x = jax.random.normal(k_feat, (BATCH, N_NODES, INPUT_DIM), jnp.float32)

    # deterministic graphs: a ring plus a chord whose offset varies per graph
    idx = jnp.arange(N_NODES)
    masks = []
    for b in range(BATCH):
        off = 2 + b
        edge_src = jnp.concatenate([idx, (idx + off) % N_NODES])
        edge_dst = jnp.concatenate([(idx + 1) % N_NODES, idx])
        edge_index = jnp.stack([edge_src, edge_dst]).astype(jnp.int32)   # [2, 32]
        masks.append(edges_to_mask_bias(edge_index, N_NODES))
    mask_bias = jnp.stack(masks)                     # [B, N, N]

    params = init_gatnet_params(k_param)
    wslab = pack_param_slab(params)                  # packed once at setup
    data = pack_graph(x, mask_bias)                  # [B, N, INPUT_DIM + N]

    out = jax.jit(gatnet_forward)(wslab, data)
    out = jax.block_until_ready(out)

    assert out.shape == (BATCH, N_NODES, NUM_OUTPUTS)
    assert bool(jnp.all(jnp.isfinite(out)))
    # rows of log_softmax must exponentiate-sum to 1
    row_sums = jnp.sum(jnp.exp(out), axis=-1)
    assert bool(jnp.all(jnp.abs(row_sums - 1.0) < 1e-4))

    # correctness vs. pure-JAX reference (same bf16/f32 numerics path)
    ref = jnp.stack([gatnet_reference(params, x[b], mask_bias[b]) for b in range(BATCH)])
    assert float(jnp.max(jnp.abs(out - ref))) < 5e-2

    print("KERNEL_OK")
</pallas_src>

<mosaic_0001>
module attributes {stable_mosaic.version = 11 : i64} {
  func.func @fused_gatnet_kernel(%arg0: i32, %arg1: memref<1x16x24xf32, #tpu.memory_space<vmem>>, %arg2: memref<112x36xbf16, #tpu.memory_space<vmem>>, %arg3: memref<1x16x6xf32, #tpu.memory_space<vmem>>) attributes {dimension_semantics = [#tpu.dimension_semantics<parallel>], iteration_bounds = array<i64: 4>, scalar_prefetch = 0 : i64, scratch_operands = 0 : i64, tpu.core_type = #tpu.core_type<tc>, window_params = [{transform_indices = @transform_0, window_bounds = array<i64: 1, 16, 24>}, {pipeline_mode = #tpu.pipeline_mode<synchronous>, transform_indices = @transform_1, window_bounds = array<i64: 112, 36>}, {transform_indices = @transform_2, window_bounds = array<i64: 1, 16, 6>}]} {
    %c0 = arith.constant 0 : index
    %c0_0 = arith.constant 0 : index
    %c0_1 = arith.constant 0 : index
    %0 = vector.load %arg1[%c0, %c0_0, %c0_1] : memref<1x16x24xf32, #tpu.memory_space<vmem>>, vector<1x16x8xf32>
    %1 = vector.shape_cast %0 : vector<1x16x8xf32> to vector<16x8xf32>
    %c0_2 = arith.constant 0 : index
    %c0_3 = arith.constant 0 : index
    %c8 = arith.constant 8 : index
    %2 = vector.load %arg1[%c0_2, %c0_3, %c8] : memref<1x16x24xf32, #tpu.memory_space<vmem>>, vector<1x16x16xf32>
    %3 = vector.shape_cast %2 : vector<1x16x16xf32> to vector<16x16xf32>
    %c0_4 = arith.constant 0 : index
    %c0_5 = arith.constant 0 : index
    %4 = vector.load %arg2[%c0_4, %c0_5] : memref<112x36xbf16, #tpu.memory_space<vmem>>, vector<8x36xbf16>
    %c8_6 = arith.constant 8 : index
    %c0_7 = arith.constant 0 : index
    %5 = vector.load %arg2[%c8_6, %c0_7] : memref<112x36xbf16, #tpu.memory_space<vmem>>, vector<1x32xbf16>
    %c16 = arith.constant 16 : index
    %c0_8 = arith.constant 0 : index
    %6 = vector.load %arg2[%c16, %c0_8] : memref<112x36xbf16, #tpu.memory_space<vmem>>, vector<32x36xbf16>
    %c48 = arith.constant 48 : index
    %c0_9 = arith.constant 0 : index
    %7 = vector.load %arg2[%c48, %c0_9] : memref<112x36xbf16, #tpu.memory_space<vmem>>, vector<1x32xbf16>
    %c64 = arith.constant 64 : index
    %c0_10 = arith.constant 0 : index
    %8 = vector.load %arg2[%c64, %c0_10] : memref<112x36xbf16, #tpu.memory_space<vmem>>, vector<32x8xbf16>
    %c96 = arith.constant 96 : index
    %c0_11 = arith.constant 0 : index
    %9 = vector.load %arg2[%c96, %c0_11] : memref<112x36xbf16, #tpu.memory_space<vmem>>, vector<1x6xbf16>
    %10 = arith.truncf %1 : vector<16x8xf32> to vector<16x8xbf16>
    %cst = arith.constant dense<0.000000e+00> : vector<16x36xf32>
    %11 = tpu.matmul %10, %4, %cst {dimension_numbers = #tpu.dot_dimension_numbers<[1], [0], [0], [1], [0, 0, 1, 1], [], []>} : vector<16x8xbf16>, vector<8x36xbf16>, vector<16x36xf32> -> vector<16x36xf32>
    %12 = vector.extract_strided_slice %11 {offsets = [0, 0], sizes = [16, 16], strides = [1, 1]} : vector<16x36xf32> to vector<16x16xf32>
    %13 = vector.extract_strided_slice %11 {offsets = [0, 32], sizes = [16, 1], strides = [1, 1]} : vector<16x36xf32> to vector<16x1xf32>
    %14 = vector.extract_strided_slice %11 {offsets = [0, 34], sizes = [16, 1], strides = [1, 1]} : vector<16x36xf32> to vector<16x1xf32>
    %15 = tpu.transpose %13, [1, 0] : vector<16x1xf32> -> vector<1x16xf32>
    %16 = vector.broadcast %14 : vector<16x1xf32> to vector<16x16xf32>
    %17 = vector.broadcast %15 : vector<1x16xf32> to vector<16x16xf32>
    %18 = arith.addf %16, %17 : vector<16x16xf32>
    %cst_12 = arith.constant 2.000000e-01 : f32
    %19 = vector.broadcast %cst_12 : f32 to vector<16x16xf32>
    %20 = arith.mulf %19, %18 : vector<16x16xf32>
    %21 = arith.maximumf %18, %20 : vector<16x16xf32>
    %22 = arith.addf %21, %3 : vector<16x16xf32>
    %cst_13 = arith.constant dense<0xFF800000> : vector<16xf32>
    %23 = vector.multi_reduction <maximumf>, %22, %cst_13 [1] : vector<16x16xf32> to vector<16xf32>
    %24 = vector.shape_cast %23 : vector<16xf32> to vector<16x1xf32>
    %25 = vector.broadcast %24 : vector<16x1xf32> to vector<16x16xf32>
    %26 = arith.subf %22, %25 : vector<16x16xf32>
    %27 = math.exp %26 : vector<16x16xf32>
    %cst_14 = arith.constant dense<0.000000e+00> : vector<16xf32>
    %28 = vector.multi_reduction <add>, %27, %cst_14 [1] : vector<16x16xf32> to vector<16xf32>
    %29 = vector.shape_cast %28 : vector<16xf32> to vector<16x1xf32>
    %30 = tpu.reciprocal %29 {approx = true} : vector<16x1xf32> -> vector<16x1xf32>
    %31 = vector.broadcast %30 : vector<16x1xf32> to vector<16x16xf32>
    %32 = arith.mulf %27, %31 : vector<16x16xf32>
    %cst_15 = arith.constant dense<0.000000e+00> : vector<16x16xf32>
    %33 = tpu.matmul %32, %12, %cst_15 {dimension_numbers = #tpu.dot_dimension_numbers<[1], [0], [0], [1], [0, 0, 1, 1], [], []>} : vector<16x16xf32>, vector<16x16xf32>, vector<16x16xf32> -> vector<16x16xf32>
    %34 = vector.extract_strided_slice %11 {offsets = [0, 16], sizes = [16, 16], strides = [1, 1]} : vector<16x36xf32> to vector<16x16xf32>
    %35 = vector.extract_strided_slice %11 {offsets = [0, 33], sizes = [16, 1], strides = [1, 1]} : vector<16x36xf32> to vector<16x1xf32>
    %36 = vector.extract_strided_slice %11 {offsets = [0, 35], sizes = [16, 1], strides = [1, 1]} : vector<16x36xf32> to vector<16x1xf32>
    %37 = tpu.transpose %35, [1, 0] : vector<16x1xf32> -> vector<1x16xf32>
    %38 = vector.broadcast %36 : vector<16x1xf32> to vector<16x16xf32>
    %39 = vector.broadcast %37 : vector<1x16xf32> to vector<16x16xf32>
    %40 = arith.addf %38, %39 : vector<16x16xf32>
    %cst_16 = arith.constant 2.000000e-01 : f32
    %41 = vector.broadcast %cst_16 : f32 to vector<16x16xf32>
    %42 = arith.mulf %41, %40 : vector<16x16xf32>
    %43 = arith.maximumf %40, %42 : vector<16x16xf32>
    %44 = arith.addf %43, %3 : vector<16x16xf32>
    %cst_17 = arith.constant dense<0xFF800000> : vector<16xf32>
    %45 = vector.multi_reduction <maximumf>, %44, %cst_17 [1] : vector<16x16xf32> to vector<16xf32>
    %46 = vector.shape_cast %45 : vector<16xf32> to vector<16x1xf32>
    %47 = vector.broadcast %46 : vector<16x1xf32> to vector<16x16xf32>
    %48 = arith.subf %44, %47 : vector<16x16xf32>
    %49 = math.exp %48 : vector<16x16xf32>
    %cst_18 = arith.constant dense<0.000000e+00> : vector<16xf32>
    %50 = vector.multi_reduction <add>, %49, %cst_18 [1] : vector<16x16xf32> to vector<16xf32>
    %51 = vector.shape_cast %50 : vector<16xf32> to vector<16x1xf32>
    %52 = tpu.reciprocal %51 {approx = true} : vector<16x1xf32> -> vector<16x1xf32>
    %53 = vector.broadcast %52 : vector<16x1xf32> to vector<16x16xf32>
    %54 = arith.mulf %49, %53 : vector<16x16xf32>
    %cst_19 = arith.constant dense<0.000000e+00> : vector<16x16xf32>
    %55 = tpu.matmul %54, %34, %cst_19 {dimension_numbers = #tpu.dot_dimension_numbers<[1], [0], [0], [1], [0, 0, 1, 1], [], []>} : vector<16x16xf32>, vector<16x16xf32>, vector<16x16xf32> -> vector<16x16xf32>
    %56 = tpu.concatenate %33, %55 in 1 : vector<16x16xf32>, vector<16x16xf32> -> vector<16x32xf32>
    %57 = arith.extf %5 : vector<1x32xbf16> to vector<1x32xf32>
    %58 = vector.broadcast %57 : vector<1x32xf32> to vector<16x32xf32>
    %59 = arith.addf %56, %58 : vector<16x32xf32>
    %cst_20 = arith.constant 0.000000e+00 : f32
    %60 = vector.broadcast %cst_20 : f32 to vector<16x32xf32>
    %61 = arith.maximumf %59, %60 : vector<16x32xf32>
    %62 = arith.truncf %61 : vector<16x32xf32> to vector<16x32xbf16>
    %cst_21 = arith.constant dense<0.000000e+00> : vector<16x36xf32>
    %63 = tpu.matmul %62, %6, %cst_21 {dimension_numbers = #tpu.dot_dimension_numbers<[1], [0], [0], [1], [0, 0, 1, 1], [], []>} : vector<16x32xbf16>, vector<32x36xbf16>, vector<16x36xf32> -> vector<16x36xf32>
    %64 = vector.extract_strided_slice %63 {offsets = [0, 0], sizes = [16, 16], strides = [1, 1]} : vector<16x36xf32> to vector<16x16xf32>
    %65 = vector.extract_strided_slice %63 {offsets = [0, 32], sizes = [16, 1], strides = [1, 1]} : vector<16x36xf32> to vector<16x1xf32>
    %66 = vector.extract_strided_slice %63 {offsets = [0, 34], sizes = [16, 1], strides = [1, 1]} : vector<16x36xf32> to vector<16x1xf32>
    %67 = tpu.transpose %65, [1, 0] : vector<16x1xf32> -> vector<1x16xf32>
    %68 = vector.broadcast %66 : vector<16x1xf32> to vector<16x16xf32>
    %69 = vector.broadcast %67 : vector<1x16xf32> to vector<16x16xf32>
    %70 = arith.addf %68, %69 : vector<16x16xf32>
    %cst_22 = arith.constant 2.000000e-01 : f32
    %71 = vector.broadcast %cst_22 : f32 to vector<16x16xf32>
    %72 = arith.mulf %71, %70 : vector<16x16xf32>
    %73 = arith.maximumf %70, %72 : vector<16x16xf32>
    %74 = arith.addf %73, %3 : vector<16x16xf32>
    %cst_23 = arith.constant dense<0xFF800000> : vector<16xf32>
    %75 = vector.multi_reduction <maximumf>, %74, %cst_23 [1] : vector<16x16xf32> to vector<16xf32>
    %76 = vector.shape_cast %75 : vector<16xf32> to vector<16x1xf32>
    %77 = vector.broadcast %76 : vector<16x1xf32> to vector<16x16xf32>
    %78 = arith.subf %74, %77 : vector<16x16xf32>
    %79 = math.exp %78 : vector<16x16xf32>
    %cst_24 = arith.constant dense<0.000000e+00> : vector<16xf32>
    %80 = vector.multi_reduction <add>, %79, %cst_24 [1] : vector<16x16xf32> to vector<16xf32>
    %81 = vector.shape_cast %80 : vector<16xf32> to vector<16x1xf32>
    %82 = tpu.reciprocal %81 {approx = true} : vector<16x1xf32> -> vector<16x1xf32>
    %83 = vector.broadcast %82 : vector<16x1xf32> to vector<16x16xf32>
    %84 = arith.mulf %79, %83 : vector<16x16xf32>
    %cst_25 = arith.constant dense<0.000000e+00> : vector<16x16xf32>
    %85 = tpu.matmul %84, %64, %cst_25 {dimension_numbers = #tpu.dot_dimension_numbers<[1], [0], [0], [1], [0, 0, 1, 1], [], []>} : vector<16x16xf32>, vector<16x16xf32>, vector<16x16xf32> -> vector<16x16xf32>
    %86 = vector.extract_strided_slice %63 {offsets = [0, 16], sizes = [16, 16], strides = [1, 1]} : vector<16x36xf32> to vector<16x16xf32>
    %87 = vector.extract_strided_slice %63 {offsets = [0, 33], sizes = [16, 1], strides = [1, 1]} : vector<16x36xf32> to vector<16x1xf32>
    %88 = vector.extract_strided_slice %63 {offsets = [0, 35], sizes = [16, 1], strides = [1, 1]} : vector<16x36xf32> to vector<16x1xf32>
    %89 = tpu.transpose %87, [1, 0] : vector<16x1xf32> -> vector<1x16xf32>
    %90 = vector.broadcast %88 : vector<16x1xf32> to vector<16x16xf32>
    %91 = vector.broadcast %89 : vector<1x16xf32> to vector<16x16xf32>
    %92 = arith.addf %90, %91 : vector<16x16xf32>
    %cst_26 = arith.constant 2.000000e-01 : f32
    %93 = vector.broadcast %cst_26 : f32 to vector<16x16xf32>
    %94 = arith.mulf %93, %92 : vector<16x16xf32>
    %95 = arith.maximumf %92, %94 : vector<16x16xf32>
    %96 = arith.addf %95, %3 : vector<16x16xf32>
    %cst_27 = arith.constant dense<0xFF800000> : vector<16xf32>
    %97 = vector.multi_reduction <maximumf>, %96, %cst_27 [1] : vector<16x16xf32> to vector<16xf32>
    %98 = vector.shape_cast %97 : vector<16xf32> to vector<16x1xf32>
    %99 = vector.broadcast %98 : vector<16x1xf32> to vector<16x16xf32>
    %100 = arith.subf %96, %99 : vector<16x16xf32>
    %101 = math.exp %100 : vector<16x16xf32>
    %cst_28 = arith.constant dense<0.000000e+00> : vector<16xf32>
    %102 = vector.multi_reduction <add>, %101, %cst_28 [1] : vector<16x16xf32> to vector<16xf32>
    %103 = vector.shape_cast %102 : vector<16xf32> to vector<16x1xf32>
    %104 = tpu.reciprocal %103 {approx = true} : vector<16x1xf32> -> vector<16x1xf32>
    %105 = vector.broadcast %104 : vector<16x1xf32> to vector<16x16xf32>
    %106 = arith.mulf %101, %105 : vector<16x16xf32>
    %cst_29 = arith.constant dense<0.000000e+00> : vector<16x16xf32>
    %107 = tpu.matmul %106, %86, %cst_29 {dimension_numbers = #tpu.dot_dimension_numbers<[1], [0], [0], [1], [0, 0, 1, 1], [], []>} : vector<16x16xf32>, vector<16x16xf32>, vector<16x16xf32> -> vector<16x16xf32>
    %108 = tpu.concatenate %85, %107 in 1 : vector<16x16xf32>, vector<16x16xf32> -> vector<16x32xf32>
    %109 = arith.extf %7 : vector<1x32xbf16> to vector<1x32xf32>
    %110 = vector.broadcast %109 : vector<1x32xf32> to vector<16x32xf32>
    %111 = arith.addf %108, %110 : vector<16x32xf32>
    %cst_30 = arith.constant 0.000000e+00 : f32
    %112 = vector.broadcast %cst_30 : f32 to vector<16x32xf32>
    %113 = arith.maximumf %111, %112 : vector<16x32xf32>
    %114 = arith.truncf %113 : vector<16x32xf32> to vector<16x32xbf16>
    %cst_31 = arith.constant dense<0.000000e+00> : vector<16x8xf32>
    %115 = tpu.matmul %114, %8, %cst_31 {dimension_numbers = #tpu.dot_dimension_numbers<[1], [0], [0], [1], [0, 0, 1, 1], [], []>} : vector<16x32xbf16>, vector<32x8xbf16>, vector<16x8xf32> -> vector<16x8xf32>
    %116 = vector.extract_strided_slice %115 {offsets = [0, 0], sizes = [16, 6], strides = [1, 1]} : vector<16x8xf32> to vector<16x6xf32>
    %117 = vector.extract_strided_slice %115 {offsets = [0, 6], sizes = [16, 1], strides = [1, 1]} : vector<16x8xf32> to vector<16x1xf32>
    %118 = vector.extract_strided_slice %115 {offsets = [0, 7], sizes = [16, 1], strides = [1, 1]} : vector<16x8xf32> to vector<16x1xf32>
    %119 = tpu.transpose %117, [1, 0] : vector<16x1xf32> -> vector<1x16xf32>
    %120 = vector.broadcast %118 : vector<16x1xf32> to vector<16x16xf32>
    %121 = vector.broadcast %119 : vector<1x16xf32> to vector<16x16xf32>
    %122 = arith.addf %120, %121 : vector<16x16xf32>
    %cst_32 = arith.constant 2.000000e-01 : f32
    %123 = vector.broadcast %cst_32 : f32 to vector<16x16xf32>
    %124 = arith.mulf %123, %122 : vector<16x16xf32>
    %125 = arith.maximumf %122, %124 : vector<16x16xf32>
    %126 = arith.addf %125, %3 : vector<16x16xf32>
    %cst_33 = arith.constant dense<0xFF800000> : vector<16xf32>
    %127 = vector.multi_reduction <maximumf>, %126, %cst_33 [1] : vector<16x16xf32> to vector<16xf32>
    %128 = vector.shape_cast %127 : vector<16xf32> to vector<16x1xf32>
    %129 = vector.broadcast %128 : vector<16x1xf32> to vector<16x16xf32>
    %130 = arith.subf %126, %129 : vector<16x16xf32>
    %131 = math.exp %130 : vector<16x16xf32>
    %cst_34 = arith.constant dense<0.000000e+00> : vector<16xf32>
    %132 = vector.multi_reduction <add>, %131, %cst_34 [1] : vector<16x16xf32> to vector<16xf32>
    %133 = vector.shape_cast %132 : vector<16xf32> to vector<16x1xf32>
    %134 = tpu.reciprocal %133 {approx = true} : vector<16x1xf32> -> vector<16x1xf32>
    %135 = vector.broadcast %134 : vector<16x1xf32> to vector<16x16xf32>
    %136 = arith.mulf %131, %135 : vector<16x16xf32>
    %cst_35 = arith.constant dense<0.000000e+00> : vector<16x6xf32>
    %137 = tpu.matmul %136, %116, %cst_35 {dimension_numbers = #tpu.dot_dimension_numbers<[1], [0], [0], [1], [0, 0, 1, 1], [], []>} : vector<16x16xf32>, vector<16x6xf32>, vector<16x6xf32> -> vector<16x6xf32>
    %138 = arith.extf %9 : vector<1x6xbf16> to vector<1x6xf32>
    %139 = vector.broadcast %138 : vector<1x6xf32> to vector<16x6xf32>
    %140 = arith.addf %137, %139 : vector<16x6xf32>
    %cst_36 = arith.constant dense<0xFF800000> : vector<16xf32>
    %141 = vector.multi_reduction <maximumf>, %140, %cst_36 [1] : vector<16x6xf32> to vector<16xf32>
    %142 = vector.shape_cast %141 : vector<16xf32> to vector<16x1xf32>
    %143 = vector.broadcast %142 : vector<16x1xf32> to vector<16x6xf32>
    %144 = arith.subf %140, %143 : vector<16x6xf32>
    %145 = math.exp %144 : vector<16x6xf32>
    %cst_37 = arith.constant dense<0.000000e+00> : vector<16xf32>
    %146 = vector.multi_reduction <add>, %145, %cst_37 [1] : vector<16x6xf32> to vector<16xf32>
    %147 = vector.shape_cast %146 : vector<16xf32> to vector<16x1xf32>
    %148 = math.log %147 : vector<16x1xf32>
    %149 = vector.broadcast %148 : vector<16x1xf32> to vector<16x6xf32>
    %150 = arith.subf %144, %149 : vector<16x6xf32>
    %c0_38 = arith.constant 0 : index
    %c0_39 = arith.constant 0 : index
    %c0_40 = arith.constant 0 : index
    %151 = vector.load %arg3[%c0_38, %c0_39, %c0_40] : memref<1x16x6xf32, #tpu.memory_space<vmem>>, vector<1x16x6xf32>
    %152 = vector.shape_cast %151 : vector<1x16x6xf32> to vector<16x6xf32>
    %153 = vector.shape_cast %150 : vector<16x6xf32> to vector<1x16x6xf32>
    tpu.vector_store %arg3[%c0_38, %c0_39, %c0_40], %153 {strides = array<i32>} : memref<1x16x6xf32, #tpu.memory_space<vmem>>, vector<1x16x6xf32>,
    return
  }
  func.func @transform_0(%arg0: i32) -> (i32, i32, i32) {
    %c0_i32 = arith.constant 0 : i32
    %c0_i32_0 = arith.constant 0 : i32
    %c0_i32_1 = arith.constant 0 : i32
    return %arg0, %c0_i32, %c0_i32_0 : i32, i32, i32
  }
  func.func @transform_1(%arg0: i32) -> (i32, i32) {
    %c0_i32 = arith.constant 0 : i32
    %c0_i32_0 = arith.constant 0 : i32
    %c0_i32_1 = arith.constant 0 : i32
    return %c0_i32, %c0_i32_0 : i32, i32
  }
  func.func @transform_2(%arg0: i32) -> (i32, i32, i32) {
    %c0_i32 = arith.constant 0 : i32
    %c0_i32_0 = arith.constant 0 : i32
    %c0_i32_1 = arith.constant 0 : i32
    return %arg0, %c0_i32, %c0_i32_0 : i32, i32, i32
  }
}

</mosaic_0001>

<bundles_post_ra>
// kernel: gatnet_forward.1
= control target key start
LH: loop header
LB: loop body
LE: loop exit
PB: predicated region body
PF: predicated region fallthrough
CT: control target
= control target key end

     0   :  { %s1539_s9 = smov 0   ;;  %s1719_s0 = inlined_call_operand.vmem [shape: f32[4,16,24], index: 0, kind: input, shape index: {}]   ;;  %s1720_s1 = inlined_call_operand.vmem [shape: bf16[112,36], index: 1, kind: input, shape index: {}]   ;;  %s1721_s2 = inlined_call_operand.vmem [shape: f32[4,16,6], index: 2, kind: output, shape index: {}]  }
   0x1 LB: > { %s1281_s10 = sadd.s32 4294967295, %s1511_s9   ;;  %p1285_p0 = scmp.ge.s32.totalorder %s1511_s9, 1  ;;  %s1511_s9 = sphi %s1539_s9, %s12_s9  }
   0x2   : > { %p112_p1 = scmp.lt.s32.totalorder %s1511_s9, 5 }
   0x4   : > { %p113_p2 = pnand %p1285_p0, %p112_p1 }
   0x5   : > { %v147_v0 = vld [vmem:[%s1720_s1] sm:$0xf] (!%p113_p2)  ;;  %vm164_vm0 = vcmask (!%p113_p2), 1043456   ;;  %p134_p3 = scmp.lt.s32.totalorder (!%p113_p2), %s1281_s10, 3  ;;  %v1513_v1 = vmov (!%p113_p2), 0.0   ;;  %vm1514_vm1 = vmmov (!%p113_p2), 0   ;;  %v257_v20 = vlaneseq (!%p113_p2) }
   0x6   : > { %116 = sbr.rel (%p113_p2) target bundleno = 3585 (0xe01), region = 28  ;;  %1339 = vmatprep.subr.bf16.mxu0 (!%p113_p2), %v1513_v1  ;;  %v166_v2 = vsel (!%p113_p2), %vm164_vm0, %v147_v0, 0  ;;  %1341 = vmatprep.mubr.msk.bf16.mxu0 (!%p113_p2), %vm1514_vm1, %v1513_v1  ;;  %vm160_vm2 = vcmask (!%p113_p2), 64512   ;;  %v1515_v6 = vmov (!%p113_p2), 35   ;;  %v1516_v7 = vmov (!%p113_p2), 34   ;;  %s1517_s17 = smov (!%p113_p2), 95  }
   0x7   : > { %1340 = vmatpush3.bf16.msra.mxu0 (!%p113_p2), %v166_v2  ;;  %1436 = vset.pattern.permute.xlu1 (!%p113_p2), %v1515_v6  ;;  %s1518_s18 = smov (!%p113_p2), 96   ;;  %s1519_s19 = smov (!%p113_p2), 120   ;;  %v258_v23 = vshrl.u32 (!%p113_p2), %v257_v20, 7  ;;  %vm277_vm3 = vcmask (!%p113_p2), 130048   ;;  %vm580_vm4 = vcmask (!%p113_p2), 261120   ;;  %vm1199_vm5 = vcmask (!%p113_p2), 48128  }
   0x8   : > { %1359 = vmatprep.subr.bf16.mxu0 (!%p113_p2), %v1513_v1  ;;  %1435 = vset.pattern.permute.xlu0 (!%p113_p2), %v1516_v7  ;;  %s1520_s20 = smov (!%p113_p2), 112   ;;  %s1521_s25 = smov (!%p113_p2), 16  }
   0x9   : > { %v1590_v26 = vsub.s32 (!%p113_p2), 0, %v258_v23  ;;  %s1523_s6 = smov (!%p113_p2), 122  }
   0xd   : > { %s1723_s10 = smov (!%p134_p3, %s1281_s10), 3 }
   0xe   : > { %s1309_s13 = sshll.u32 %s1723_s10, 4 }
   0xf   : > { %s138_s16 = scalar_lea.vmem %s1719_s0, %s1309_s13  ;;  %s143_s14 = scalar_lea.vmem %s1721_s2, %s1309_s13 }
  0x10   : > { %v145_v3 = vld [vmem:[%s138_s16] sm:$0xff]  ;;  %v146_v4 = vld [vmem:[%s138_s16 + $0x8] sm:$0xff] }
  0x11   : > { %v159_v5 = vpack.c.bf16 %v146_v4, %v145_v3 }
  0x13   : > { %1342 = vmatmul.mubr.msk.bf16.vlgmr.msra.gmra.mrb[0].mxu0 %vm160_vm2, %v159_v5 }
  0x14   : > { %1363 = vmatprep.mubr.msk.bf16.mxu0 %vm1514_vm1, %v1513_v1 }
  0xe6   : > { %v1565_v8 = vpop.f32.mrb[0].mxu0 }
  0xe7   : > { %381 = vrot.lane.b32.xlu1 %v1565_v8, %s1517_s17  ;;  %211 = vrot.lane.b32.xlu0 %v1565_v8, %s1518_s18  ;;  %v1343_v9 = vpop.f32.mrb[1].mxu0 }
  0xe8   : > { %v1571_v10 = vpop.f32.mrb[2].mxu0 }
  0xe9   : > { %v1344_v11 = vpop.f32.mrb[3].mxu0  ;;  %v1396_v12 = vpack.c.bf16 %v1571_v10, %v1565_v8  ;;  %v1439_v13 = vpack.i.bf16 %v1571_v10, %v1565_v8 }
  0xeb   : > { %383 = vrot.lane.b32.xlu1 %v1571_v10, %s1517_s17  ;;  %213 = vrot.lane.b32.xlu0 %v1571_v10, %s1518_s18 }
  0xec   : > { %1397 = vmatprep.subr.bf16.mxu1 %v1396_v12 }
  0xed   : > { %1399 = vmatpush3.bf16.msra.mxu1 %v1396_v12 }
  0xef   : > { %420 = vperm.xlu1 %1436, %v1565_v8   ;;  %250 = vperm.xlu0 %1435, %v1565_v8  }
  0xf3   : > { %269 = vrot.lane.b32.xlu1 %v145_v3, %s1519_s19  ;;  %1438 = vset.pattern.permute.xlu0 %v1515_v6 }
  0xf4   : > { %424 = vperm.xlu0 %1438, %v1571_v10   ;;  %1437 = vset.pattern.permute.xlu1 %v1516_v7 }
  0xf7   : > { %271 = vrot.lane.b32.xlu1 %v146_v4, %s1519_s19 }
  0xfb   : > { %254 = vperm.xlu1 %1437, %v1571_v10  }
 0x159   : > { %v382_v14 = vpop.permute.xlu1 %381  ;;  %v212_v15 = vpop.permute.xlu0 %211 }
 0x15a   : > { %387 = vxpose.xlu1.b32.start [1/2] (short) (narrow) %v382_v14, 8  ;;  %217 = vxpose.xlu0.b32.start [1/2] (short) (narrow) %v212_v15, 8 }
 0x15d   : > { %v384_v16 = vpop.permute.xlu1 %383  ;;  %v214_v17 = vpop.permute.xlu0 %213 }
 0x15e   : > { %388 = vxpose.xlu1.b32.end [2/2] (short) (narrow) %v384_v16, 8  ;;  %218 = vxpose.xlu0.b32.end [2/2] (short) (narrow) %v214_v17, 8 }
 0x16e   : > { %v421_v18 = vpop.permute.xlu1 %420  ;;  %v251_v21 = vpop.permute.xlu0 %250 }
 0x172   : > { %v1586_v19 = vpop.permute.xlu1 %269 }
 0x173   : > { %v425_v24 = vpop.permute.xlu0 %424 }
 0x176   : > { %v1588_v22 = vpop.permute.xlu1 %271 }
 0x17a   : > { %v255_v25 = vpop.permute.xlu1 %254 }
 0x187   : > { %1445 = vset.pattern.permute.xlu0 %v1516_v7 }
 0x1da   : > { %v403_v27 = vpop.trf.xlu1  ;;  %v233_v28 = vpop.trf.xlu0 }
 0x1db   : > { %v430_v29 = vrot.slane %v403_v27, %v1590_v26  ;;  %v260_v30 = vrot.slane %v233_v28, %v1590_v26  ;;  %v1453_v28 = vld [vmem:[%s1720_s1 + $0x8] sm:$0xff]  }
 0x1dc   : > { %1360 = vmatpush3.bf16.msra.mxu0 %v1453_v28 }
 0x1dd   : > { %v431_v31 = vadd.f32 %v430_v29, %v421_v18  ;;  %v432_v32 = vadd.f32 %v430_v29, %v425_v24  ;;  %v261_v33 = vadd.f32 %v260_v30, %v251_v21  ;;  %v262_v34 = vadd.f32 %v260_v30, %v255_v25  ;;  %1361 = vmatprep.subr.bf16.mxu0 %v1513_v1  ;;  %v1454_v29 = vld [vmem:[%s1720_s1 + $0x10] sm:$0xff]  }
 0x1df   : > { %v433_v35 = vmul.f32 0.2, %v431_v31  ;;  %v263_v36 = vmul.f32 0.2, %v261_v33  ;;  %v264_v37 = vmul.f32 0.2, %v262_v34 }
 0x1e0   : > { %v434_v38 = vmul.f32 0.2, %v432_v32  ;;  %1362 = vmatpush3.bf16.msra.mxu0 %v1454_v29 }
 0x1e1   : > { %v265_v39 = vmax.f32 %v261_v33, %v263_v36  ;;  %v435_v40 = vmax.f32 %v431_v31, %v433_v35  ;;  %v266_v41 = vmax.f32 %v262_v34, %v264_v37  ;;  %1381 = vmatprep.subr.bf16.mxu0 %v1513_v1  ;;  %v148_v34 = vld [vmem:[%s1720_s1 + $0x4] sm:$0x1] }
 0x1e2   : > { %v436_v46 = vmax.f32 %v432_v32, %v434_v38  ;;  %v558_v35 = vunpack.c.l.bf16 %v148_v34 }
 0x1e3   : > { %v275_v42 = vadd.f32 %v1586_v19, %v265_v39  ;;  %v276_v43 = vadd.f32 %v1588_v22, %v266_v41  ;;  %v437_v45 = vadd.f32 %v435_v40, %v1586_v19 }
 0x1e4   : > { %v438_v49 = vadd.f32 %v436_v46, %v1588_v22  ;;  %v562_v36 = vrot.slane %v558_v35, %v1590_v26 }
 0x1e5   : > { %v278_v44 = vsel %vm277_vm3, %v275_v42, -inf  ;;  %v281_v47 = vsel %vm277_vm3, %v276_v43, -inf  ;;  %v439_v48 = vsel %vm277_vm3, %v437_v45, -inf }
 0x1e6   : > { %279 = vmax.xlane.f32.xlu0 %v278_v44  ;;  %282 = vmax.xlane.f32.xlu1 %v281_v47  ;;  %v442_v50 = vsel %vm277_vm3, %v438_v49, -inf }
 0x1ea   : > { %440 = vmax.xlane.f32.xlu0 %v439_v48 }
 0x1ee   : > { %443 = vmax.xlane.f32.xlu0 %v442_v50 }
 0x273   : > { %v280_v51 = vpop.xlane.xlu0 %279  ;;  %v283_v52 = vpop.xlane.xlu1 %282 }
 0x274   : > { %v284_v53 = vsub.f32 %v275_v42, %v280_v51  ;;  %v285_v54 = vsub.f32 %v276_v43, %v283_v52 }
 0x276   : > { %v286_v55 = vmul.f32 1.442695, %v284_v53  ;;  %v288_v56 = vmul.f32 1.442695, %v285_v54 }
 0x277   : > { %v441_v57 = vpop.xlane.xlu0 %440 }
 0x278   : > { %1457 = vpow2.f32 %v286_v55  ;;  %v445_v58 = vsub.f32 %v437_v45, %v441_v57 }
 0x279   : > { %1459 = vpow2.f32 %v288_v56 }
 0x27a   : > { %v447_v59 = vmul.f32 1.442695, %v445_v58 }
 0x27b   : > { %v444_v60 = vpop.xlane.xlu0 %443 }
 0x27c   : > { %1461 = vpow2.f32 %v447_v59  ;;  %v446_v61 = vsub.f32 %v438_v49, %v444_v60 }
 0x27e   : > { %v449_v62 = vmul.f32 1.442695, %v446_v61 }
 0x280   : > { %1463 = vpow2.f32 %v449_v62 }
 0x282   : > { %v1458_v63 = vpop.eup %1457 }
 0x283   : > { %v1460_v0 = vpop.eup %1459  ;;  %v290_v2 = vsel %vm277_vm3, %v1458_v63, 0.0 }
 0x284   : > { %v293_v3 = vsel %vm277_vm3, %v1460_v0, 0.0  ;;  %291 = vadd.xlane.f32.xlu1 %v290_v2 }
 0x285   : > { %294 = vadd.xlane.f32.xlu0 %v293_v3 }
 0x286   : > { %v1462_v4 = vpop.eup %1461 }
 0x287   : > { %v451_v5 = vsel %vm277_vm3, %v1462_v4, 0.0 }
 0x288   : > { %452 = vadd.xlane.f32.xlu1 %v451_v5 }
 0x28a   : > { %v1464_v7 = vpop.eup %1463 }
 0x28b   : > { %v454_v9 = vsel %vm277_vm3, %v1464_v7, 0.0 }
 0x28c   : > { %455 = vadd.xlane.f32.xlu0 %v454_v9 }
 0x299   : > { %1440 = vrot.lane.b32.xlu1 %v1439_v13, %s1520_s20 }
 0x311   : > { %v292_v11 = vpop.xlane.xlu1 %291 }
 0x312   : > { %1465 = vrcp.f32 %v292_v11  ;;  %v295_v12 = vpop.xlane.xlu0 %294 }
 0x313   : > { %1467 = vrcp.f32 %v295_v12 }
 0x315   : > { %v453_v14 = vpop.xlane.xlu1 %452 }
 0x316   : > { %1469 = vrcp.f32 %v453_v14 }
 0x319   : > { %v1441_v15 = vpop.permute.xlu1 %1440  ;;  %v456_v16 = vpop.xlane.xlu0 %455 }
 0x31a   : > { %v1443_v17 = vunpack.i.h.bf16 %v1441_v15  ;;  %v1442_v18 = vunpack.i.l.bf16 %v1441_v15  ;;  %1471 = vrcp.f32 %v456_v16 }
 0x31c   : > { %v1466_v20 = vpop.eup %1465  ;;  %v1400_v21 = vpack.c.bf16 %v1443_v17, %v1442_v18 }
 0x31d   : > { %v1468_v23 = vpop.eup %1467  ;;  %v298_v24 = vmul.f32 %v1466_v20, %v1458_v63 }
 0x31e   : > { %1401 = vmatprep.subr.bf16.mxu1 %v1400_v21  ;;  %v299_v25 = vmul.f32 %v1468_v23, %v1460_v0 }
 0x31f   : > { %1349 = vmatprep.mubr.msk.f32.mxu1 %vm277_vm3, %v298_v24 }
 0x320   : > { %v1470_v8 = vpop.eup %1469  ;;  %1350 = vmatmul.mubr.msk.f32.vlgmr.msra.gmra.mrb[0].mxu1 %vm277_vm3, %v299_v25 }
 0x321   : > { %1403 = vmatpush3.bf16.msra.mxu1 %v1400_v21  ;;  %v459_v10 = vmul.f32 %v1470_v8, %v1462_v4 }
 0x323   : > { %1356 = vmatprep.mubr.msk.f32.mxu1 %vm277_vm3, %v459_v10 }
 0x324   : > { %v1472_v13 = vpop.eup %1471 }
 0x325   : > { %v460_v27 = vmul.f32 %v1472_v13, %v1464_v7 }
 0x327   : > { %1357 = vmatmul.mubr.msk.f32.vlgmr.msra.gmra.mrb[2].mxu1 %vm277_vm3, %v460_v27 }
 0x3f3   : > { %v1351_v30 = vpop.f32.mrb[0].mxu1 }
 0x3f4   : > { %v372_v31 = vpop.f32.mrb[1].mxu1 }
 0x3fa   : > { %v1358_v32 = vpop.f32.mrb[2].mxu1 }
 0x3fb   : > { %552 = vrot.lane.b32.xlu1 %v1358_v32, %s1521_s25  ;;  %v539_v33 = vpop.f32.mrb[3].mxu1 }
 0x3fc   : > { %550 = vrot.lane.b32.xlu0 %v539_v33, %s1521_s25 }
 0x46d   : > { %v553_v37 = vpop.permute.xlu1 %552 }
 0x46e   : > { %v557_v38 = vsel %vm277_vm3, %v1351_v30, %v553_v37  ;;  %v551_v39 = vpop.permute.xlu0 %550 }
 0x46f   : > { %v564_v40 = vadd.f32 %v562_v36, %v557_v38  ;;  %v556_v41 = vsel %vm277_vm3, %v372_v31, %v551_v39 }
 0x470   : > { %v563_v42 = vadd.f32 %v562_v36, %v556_v41 }
 0x471   : > { %v566_v43 = vmax.f32 %v564_v40, 0.0 }
 0x472   : > { %v565_v44 = vmax.f32 %v563_v42, 0.0 }
 0x474   : > { %v567_v45 = vpack.c.bf16 %v566_v43, %v565_v44 }
 0x476   : > { %1364 = vmatmul.mubr.msk.bf16.vlgmr.msra.gmra.mrb[4].mxu0 %vm580_vm4, %v567_v45 }
 0x477   : > { %1385 = vmatprep.mubr.msk.bf16.mxu0 %vm1514_vm1, %v1513_v1 }
 0x549   : > { %v1633_v46 = vpop.f32.mrb[4].mxu0 }
 0x54a   : > { %627 = vrot.lane.b32.xlu1 %v1633_v46, %s1518_s18  ;;  %v1365_v47 = vpop.f32.mrb[5].mxu0 }
 0x54b   : > { %v1637_v48 = vpop.f32.mrb[6].mxu0 }
 0x54c   : > { %629 = vrot.lane.b32.xlu0 %v1637_v48, %s1518_s18  ;;  %v1366_v49 = vpop.f32.mrb[7].mxu0  ;;  %v1404_v50 = vpack.c.bf16 %v1637_v48, %v1633_v46  ;;  %v1446_v51 = vpack.i.bf16 %v1637_v48, %v1633_v46 }
 0x54e   : > { %788 = vrot.lane.b32.xlu1 %v1633_v46, %s1517_s17  ;;  %1405 = vmatprep.subr.bf16.mxu1 %v1404_v50 }
 0x54f   : > { %1407 = vmatpush3.bf16.msra.mxu1 %v1404_v50 }
 0x550   : > { %790 = vrot.lane.b32.xlu0 %v1637_v48, %s1517_s17 }
 0x552   : > { %666 = vperm.xlu1 %1437, %v1633_v46  }
 0x554   : > { %670 = vperm.xlu0 %1445, %v1637_v48  }
 0x556   : > { %1444 = vset.pattern.permute.xlu1 %v1515_v6 }
 0x557   : > { %827 = vperm.xlu1 %1444, %v1633_v46  }
 0x55b   : > { %831 = vperm.xlu1 %1444, %v1637_v48  }
 0x5bc   : > { %v628_v52 = vpop.permute.xlu1 %627 }
 0x5bd   : > { %633 = vxpose.xlu0.b32.start [1/2] (short) (narrow) %v628_v52, 8 }
 0x5be   : > { %v630_v53 = vpop.permute.xlu0 %629 }
 0x5c0   : > { %v789_v54 = vpop.permute.xlu1 %788 }
 0x5c1   : > { %794 = vxpose.xlu1.b32.start [1/2] (short) (narrow) %v789_v54, 8  ;;  %634 = vxpose.xlu0.b32.end [2/2] (short) (narrow) %v630_v53, 8 }
 0x5c2   : > { %v791_v55 = vpop.permute.xlu0 %790 }
 0x5c5   : > { %795 = vxpose.xlu1.b32.end [2/2] (short) (narrow) %v791_v55, 8 }
 0x5d1   : > { %v667_v56 = vpop.permute.xlu1 %666 }
 0x5d3   : > { %v671_v58 = vpop.permute.xlu0 %670 }
 0x5d6   : > { %v828_v57 = vpop.permute.xlu1 %827 }
 0x5da   : > { %v832_v59 = vpop.permute.xlu1 %831 }
 0x63d   : > { %v649_v60 = vpop.trf.xlu0 }
 0x63e   : > { %v676_v61 = vrot.slane %v649_v60, %v1590_v26  ;;  %v1455_v60 = vld [vmem:[%s1720_s1 + $0x20] sm:$0xff]  }
 0x63f   : > { %1382 = vmatpush3.bf16.msra.mxu0 %v1455_v60 }
 0x640   : > { %v677_v6 = vadd.f32 %v676_v61, %v667_v56  ;;  %v678_v62 = vadd.f32 %v676_v61, %v671_v58  ;;  %1383 = vmatprep.subr.bf16.mxu0 %v1513_v1  ;;  %v1456_v61 = vld [vmem:[%s1720_s1 + $0x28] sm:$0xff]  }
 0x641   : > { %v810_v63 = vpop.trf.xlu1 }
 0x642   : > { %v679_v0 = vmul.f32 0.2, %v677_v6  ;;  %v680_v2 = vmul.f32 0.2, %v678_v62  ;;  %v837_v3 = vrot.slane %v810_v63, %v1590_v26 }
 0x643   : > { %1384 = vmatpush3.bf16.msra.mxu0 %v1456_v61 }
 0x644   : > { %v838_v4 = vadd.f32 %v837_v3, %v828_v57  ;;  %v839_v5 = vadd.f32 %v837_v3, %v832_v59  ;;  %v682_v7 = vmax.f32 %v678_v62, %v680_v2  ;;  %v681_v9 = vmax.f32 %v677_v6, %v679_v0  ;;  %v153_v2 = vld [vmem:[%s1720_s1 + $0x18] sm:$0x1] }
 0x645   : > { %v965_v3 = vunpack.c.l.bf16 %v153_v2 }
 0x646   : > { %v840_v11 = vmul.f32 0.2, %v838_v4  ;;  %v841_v12 = vmul.f32 0.2, %v839_v5  ;;  %v684_v14 = vadd.f32 %v682_v7, %v1588_v22  ;;  %v683_v15 = vadd.f32 %v681_v9, %v1586_v19 }
 0x647   : > { %v969_v1 = vrot.slane %v965_v3, %v1590_v26 }
 0x648   : > { %v688_v16 = vsel %vm277_vm3, %v684_v14, -inf  ;;  %v685_v17 = vsel %vm277_vm3, %v683_v15, -inf  ;;  %v842_v18 = vmax.f32 %v838_v4, %v840_v11  ;;  %v843_v20 = vmax.f32 %v839_v5, %v841_v12 }
 0x649   : > { %689 = vmax.xlane.f32.xlu1 %v688_v16  ;;  %686 = vmax.xlane.f32.xlu0 %v685_v17  ;;  %v1522_v17 = vmov 7  }
 0x64a   : > { %v844_v21 = vadd.f32 %v842_v18, %v1586_v19  ;;  %v845_v24 = vadd.f32 %v843_v20, %v1588_v22  ;;  %1451 = vset.pattern.permute.xlu1 %v1522_v17  ;;  %1452 = vset.pattern.permute.xlu0 %v1522_v17 }
 0x64c   : > { %v846_v23 = vsel %vm277_vm3, %v844_v21, -inf  ;;  %v849_v25 = vsel %vm277_vm3, %v845_v24, -inf }
 0x64d   : > { %847 = vmax.xlane.f32.xlu0 %v846_v23 }
 0x651   : > { %850 = vmax.xlane.f32.xlu0 %v849_v25 }
 0x6d6   : > { %v690_v8 = vpop.xlane.xlu1 %689  ;;  %v687_v10 = vpop.xlane.xlu0 %686 }
 0x6d7   : > { %v692_v13 = vsub.f32 %v684_v14, %v690_v8  ;;  %v691_v27 = vsub.f32 %v683_v15, %v687_v10 }
 0x6d9   : > { %v695_v28 = vmul.f32 1.442695, %v692_v13  ;;  %v693_v29 = vmul.f32 1.442695, %v691_v27 }
 0x6da   : > { %v848_v30 = vpop.xlane.xlu0 %847 }
 0x6db   : > { %1473 = vpow2.f32 %v695_v28  ;;  %v852_v31 = vsub.f32 %v844_v21, %v848_v30 }
 0x6dc   : > { %1475 = vpow2.f32 %v693_v29 }
 0x6dd   : > { %v854_v32 = vmul.f32 1.442695, %v852_v31 }
 0x6de   : > { %v851_v33 = vpop.xlane.xlu0 %850 }
 0x6df   : > { %1477 = vpow2.f32 %v854_v32  ;;  %v853_v34 = vsub.f32 %v845_v24, %v851_v33 }
 0x6e1   : > { %v856_v35 = vmul.f32 1.442695, %v853_v34 }
 0x6e3   : > { %1479 = vpow2.f32 %v856_v35 }
 0x6e5   : > { %v1474_v36 = vpop.eup %1473 }
 0x6e6   : > { %v1476_v37 = vpop.eup %1475  ;;  %v700_v38 = vsel %vm277_vm3, %v1474_v36, 0.0 }
 0x6e7   : > { %701 = vadd.xlane.f32.xlu0 %v700_v38  ;;  %v697_v39 = vsel %vm277_vm3, %v1476_v37, 0.0 }
 0x6e8   : > { %698 = vadd.xlane.f32.xlu1 %v697_v39 }
 0x6e9   : > { %v1478_v40 = vpop.eup %1477 }
 0x6ea   : > { %v858_v41 = vsel %vm277_vm3, %v1478_v40, 0.0 }
 0x6ec   : > { %859 = vadd.xlane.f32.xlu1 %v858_v41 }
 0x6ed   : > { %v1480_v42 = vpop.eup %1479 }
 0x6ee   : > { %v861_v43 = vsel %vm277_vm3, %v1480_v42, 0.0 }
 0x6ef   : > { %862 = vadd.xlane.f32.xlu0 %v861_v43 }
 0x6fd   : > { %1447 = vrot.lane.b32.xlu1 %v1446_v51, %s1520_s20 }
 0x774   : > { %v702_v44 = vpop.xlane.xlu0 %701 }
 0x775   : > { %v699_v45 = vpop.xlane.xlu1 %698  ;;  %1481 = vrcp.f32 %v702_v44 }
 0x776   : > { %1483 = vrcp.f32 %v699_v45 }
 0x779   : > { %v860_v47 = vpop.xlane.xlu1 %859 }
 0x77a   : > { %1485 = vrcp.f32 %v860_v47 }
 0x77c   : > { %v863_v49 = vpop.xlane.xlu0 %862 }
 0x77d   : > { %v1448_v50 = vpop.permute.xlu1 %1447  ;;  %1487 = vrcp.f32 %v863_v49 }
 0x77e   : > { %v1450_v52 = vunpack.i.h.bf16 %v1448_v50  ;;  %v1449_v53 = vunpack.i.l.bf16 %v1448_v50 }
 0x77f   : > { %v1482_v54 = vpop.eup %1481 }
 0x780   : > { %v1484_v55 = vpop.eup %1483  ;;  %v706_v56 = vmul.f32 %v1482_v54, %v1474_v36  ;;  %v1408_v57 = vpack.c.bf16 %v1450_v52, %v1449_v53 }
 0x781   : > { %v705_v58 = vmul.f32 %v1484_v55, %v1476_v37 }
 0x782   : > { %1409 = vmatprep.subr.bf16.mxu1 %v1408_v57 }
 0x783   : > { %1371 = vmatprep.mubr.msk.f32.mxu1 %vm277_vm3, %v705_v58 }
 0x784   : > { %v1486_v46 = vpop.eup %1485  ;;  %1372 = vmatmul.mubr.msk.f32.vlgmr.msra.gmra.mrb[4].mxu1 %vm277_vm3, %v706_v56  ;;  %v158_v56 = vld [vmem:[%s1720_s1 + $0x30] sm:$0x1] }
 0x785   : > { %1411 = vmatpush3.bf16.msra.mxu1 %v1408_v57  ;;  %v866_v48 = vmul.f32 %v1486_v46, %v1478_v40  ;;  %v1113_v57 = vunpack.c.l.bf16 %v158_v56 }
 0x787   : > { %v1488_v51 = vpop.eup %1487  ;;  %1378 = vmatprep.mubr.msk.f32.mxu1 %vm277_vm3, %v866_v48  ;;  %v1117_v58 = vrot.slane %v1113_v57, %v1590_v26 }
 0x788   : > { %v867_v59 = vmul.f32 %v1488_v51, %v1480_v42 }
 0x78a   : > { %1379 = vmatmul.mubr.msk.f32.vlgmr.msra.gmra.mrb[6].mxu1 %vm277_vm3, %v867_v59 }
 0x857   : > { %v1373_v6 = vpop.f32.mrb[4].mxu1 }
 0x858   : > { %v779_v62 = vpop.f32.mrb[5].mxu1 }
 0x85d   : > { %v1380_v63 = vpop.f32.mrb[6].mxu1 }
 0x85e   : > { %959 = vrot.lane.b32.xlu1 %v1380_v63, %s1521_s25  ;;  %v946_v0 = vpop.f32.mrb[7].mxu1 }
 0x85f   : > { %957 = vrot.lane.b32.xlu0 %v946_v0, %s1521_s25 }
 0x8d0   : > { %v960_v4 = vpop.permute.xlu1 %959 }
 0x8d1   : > { %v964_v5 = vsel %vm277_vm3, %v1373_v6, %v960_v4  ;;  %v958_v7 = vpop.permute.xlu0 %957 }
 0x8d2   : > { %v971_v9 = vadd.f32 %v969_v1, %v964_v5  ;;  %v963_v11 = vsel %vm277_vm3, %v779_v62, %v958_v7 }
 0x8d3   : > { %v970_v12 = vadd.f32 %v969_v1, %v963_v11 }
 0x8d4   : > { %v973_v14 = vmax.f32 %v971_v9, 0.0 }
 0x8d5   : > { %v972_v15 = vmax.f32 %v970_v12, 0.0 }
 0x8d7   : > { %v974_v16 = vpack.c.bf16 %v973_v14, %v972_v15 }
 0x8d9   : > { %1386 = vmatmul.mubr.msk.bf16.vlgmr.msra.gmra.mrb[8].mxu0 %vm580_vm4, %v974_v16 }
 0x9ac   : > { %v1024_v18 = vpop.f32.mrb[8].mxu0 }
 0x9ad   : > { %1033 = vrot.lane.b32.xlu1 %v1024_v18, %s1523_s6  ;;  %v1387_v20 = vpop.f32.mrb[9].mxu0 }
 0x9ae   : > { %v1027_v21 = vpop.f32.mrb[10].mxu0 }
 0x9af   : > { %v1412_v23 = vpack.c.bf16 %v1027_v21, %v1024_v18  ;;  %1035 = vrot.lane.b32.xlu0 %v1027_v21, %s1523_s6  ;;  %v1388_v24 = vpop.f32.mrb[11].mxu0 }
 0x9b1   : > { %1072 = vperm.xlu1 %1451, %v1024_v18   ;;  %1413 = vmatprep.subr.bf16.mxu1 %v1412_v23 }
 0x9b2   : > { %1415 = vmatpush3.bf16.msra.mxu1 %v1412_v23 }
 0x9b3   : > { %1076 = vperm.xlu0 %1452, %v1027_v21  }
 0xa1f   : > { %v1034_v25 = vpop.permute.xlu1 %1033 }
 0xa20   : > { %1039 = vxpose.xlu1.b32.start [1/2] (short) (narrow) %v1034_v25, 8 }
 0xa21   : > { %v1036_v8 = vpop.permute.xlu0 %1035 }
 0xa24   : > { %1040 = vxpose.xlu1.b32.end [2/2] (short) (narrow) %v1036_v8, 8 }
 0xa30   : > { %v1073_v10 = vpop.permute.xlu1 %1072 }
 0xa32   : > { %v1077_v28 = vpop.permute.xlu0 %1076 }
 0xaa0   : > { %v1055_v13 = vpop.trf.xlu1 }
 0xaa1   : > { %v1082_v27 = vrot.slane %v1055_v13, %v1590_v26 }
 0xaa3   : > { %v1083_v29 = vadd.f32 %v1082_v27, %v1073_v10  ;;  %v1084_v30 = vadd.f32 %v1082_v27, %v1077_v28 }
 0xaa5   : > { %v1085_v31 = vmul.f32 0.2, %v1083_v29  ;;  %v1086_v32 = vmul.f32 0.2, %v1084_v30 }
 0xaa7   : > { %v1087_v33 = vmax.f32 %v1083_v29, %v1085_v31  ;;  %v1088_v34 = vmax.f32 %v1084_v30, %v1086_v32 }
 0xaa9   : > { %v1089_v35 = vadd.f32 %v1087_v33, %v1586_v19  ;;  %v1090_v37 = vadd.f32 %v1088_v34, %v1588_v22 }
 0xaab   : > { %v1091_v36 = vsel %vm277_vm3, %v1089_v35, -inf  ;;  %v1094_v38 = vsel %vm277_vm3, %v1090_v37, -inf }
 0xaac   : > { %1092 = vmax.xlane.f32.xlu0 %v1091_v36 }
 0xab0   : > { %1095 = vmax.xlane.f32.xlu0 %v1094_v38 }
 0xb39   : > { %v1093_v39 = vpop.xlane.xlu0 %1092 }
 0xb3a   : > { %v1097_v40 = vsub.f32 %v1089_v35, %v1093_v39 }
 0xb3c   : > { %v1099_v41 = vmul.f32 1.442695, %v1097_v40 }
 0xb3d   : > { %v1096_v42 = vpop.xlane.xlu0 %1095 }
 0xb3e   : > { %1489 = vpow2.f32 %v1099_v41  ;;  %v1098_v43 = vsub.f32 %v1090_v37, %v1096_v42 }
 0xb40   : > { %v1101_v44 = vmul.f32 1.442695, %v1098_v43 }
 0xb42   : > { %1491 = vpow2.f32 %v1101_v44 }
 0xb48   : > { %v1490_v45 = vpop.eup %1489 }
 0xb49   : > { %v1103_v47 = vsel %vm277_vm3, %v1490_v45, 0.0 }
 0xb4a   : > { %1104 = vadd.xlane.f32.xlu0 %v1103_v47 }
 0xb4c   : > { %v1492_v19 = vpop.eup %1491 }
 0xb4d   : > { %v1106_v49 = vsel %vm277_vm3, %v1492_v19, 0.0 }
 0xb4e   : > { %1107 = vadd.xlane.f32.xlu1 %v1106_v49 }
 0xbd7   : > { %v1105_v22 = vpop.xlane.xlu0 %1104 }
 0xbd8   : > { %1493 = vrcp.f32 %v1105_v22 }
 0xbdb   : > { %v1108_v50 = vpop.xlane.xlu1 %1107 }
 0xbdc   : > { %1495 = vrcp.f32 %v1108_v50 }
 0xbe2   : > { %v1494_v52 = vpop.eup %1493 }
 0xbe3   : > { %v1111_v53 = vmul.f32 %v1494_v52, %v1490_v45 }
 0xbe5   : > { %1393 = vmatprep.mubr.msk.f32.mxu1 %vm277_vm3, %v1111_v53 }
 0xbe6   : > { %v1496_v54 = vpop.eup %1495 }
 0xbe7   : > { %v1112_v55 = vmul.f32 %v1496_v54, %v1492_v19 }
 0xbe9   : > { %1394 = vmatmul.mubr.msk.f32.vlgmr.msra.gmra.mrb[8].mxu1 %vm277_vm3, %v1112_v55 }
 0xcbc   : > { %v1395_v46 = vpop.f32.mrb[8].mxu1 }
 0xcbd   : > { %v1190_v48 = vpop.f32.mrb[9].mxu1  ;;  %v1196_v59 = vadd.f32 %v1395_v46, %v1117_v58 }
 0xcbe   : > { %v1191_v51 = vadd.f32 %v1190_v48, %v1117_v58 }
 0xcbf   : > { %v1203_v61 = vsel %vm1199_vm5, %v1196_v59, -inf }
 0xcc0   : > { %v1200_v60 = vsel %vm1199_vm5, %v1191_v51, -inf }
 0xcc1   : > { %1201 = vmax.xlane.f32.xlu0 %v1200_v60 }
 0xcc5   : > { %1204 = vmax.xlane.f32.xlu0 %v1203_v61 }
 0xd4e   : > { %v1202_v6 = vpop.xlane.xlu0 %1201 }
 0xd4f   : > { %v1206_v62 = vsub.f32 %v1191_v51, %v1202_v6 }
 0xd51   : > { %v1208_v63 = vmul.f32 1.442695, %v1206_v62 }
 0xd52   : > { %v1205_v0 = vpop.xlane.xlu0 %1204 }
 0xd53   : > { %1497 = vpow2.f32 %v1208_v63  ;;  %v1207_v2 = vsub.f32 %v1196_v59, %v1205_v0 }
 0xd55   : > { %v1210_v3 = vmul.f32 1.442695, %v1207_v2 }
 0xd57   : > { %1499 = vpow2.f32 %v1210_v3 }
 0xd5d   : > { %v1498_v26 = vpop.eup %1497 }
 0xd5e   : > { %v1212_v1 = vsel %vm1199_vm5, %v1498_v26, 0.0 }
 0xd5f   : > { %1213 = vadd.xlane.f32.xlu0 %v1212_v1 }
 0xd61   : > { %v1500_v4 = vpop.eup %1499 }
 0xd62   : > { %v1215_v5 = vsel %vm1199_vm5, %v1500_v4, 0.0 }
 0xd63   : > { %1216 = vadd.xlane.f32.xlu0 %v1215_v5 }
 0xdec   : > { %v1214_v7 = vpop.xlane.xlu0 %1213 }
 0xded   : > { %1501 = vlog2.f32 %v1214_v7 }
 0xdf0   : > { %v1217_v9 = vpop.xlane.xlu0 %1216 }
 0xdf1   : > { %1503 = vlog2.f32 %v1217_v9 }
 0xdf7   : > { %v1502_v11 = vpop.eup %1501 }
 0xdf8   : > { %v1219_v12 = vmul.f32 0.6931472, %v1502_v11 }
 0xdfa   : > { %v1222_v14 = vsub.f32 %v1206_v62, %v1219_v12 }
 0xdfb   : > { %v1504_v15 = vpop.eup %1503 }
 0xdfc   : > { %1224 = vst.msk [vmem:[%s143_s14] sm:$0xff] %vm1199_vm5, %v1222_v14  ;;  %v1221_v16 = vmul.f32 0.6931472, %v1504_v15 }
 0xdfe   : > { %v1223_v17 = vsub.f32 %v1207_v2, %v1221_v16 }
 0xe00   : > { %1225 = vst.msk [vmem:[%s143_s14 + $0x8] sm:$0xff] %vm1199_vm5, %v1223_v17 }
 0xe01 PF: > { %s12_s9 = sadd.s32 1, %s1511_s9  }
 0xe02   : > { %p9_p4 = scmp.ge.s32.totalorder %s12_s9, 6  }
 0xe04   :  { %11 = sbr.rel (!%p9_p4) target bundleno = 1 (0x1), region = 58 }

</bundles_post_ra>
